<compile_context>
chip_gen: v6e
topology: v6e:2x2x1
jax: 0.10.0
libtpu: 0.0.40
codegen_flags: <defaults>
</compile_context>

<pallas_src>
import functools

import jax
import jax.numpy as jnp
from jax import lax
from jax.experimental import pallas as pl
from jax.experimental.pallas import tpu as pltpu


# ---------------------------------------------------------------------------
# Generation-aware VMEM budget / tile helpers
# ---------------------------------------------------------------------------
@functools.lru_cache(maxsize=1)
def _vmem_budget():
    """Scoped-VMEM budget (bytes) with headroom for Mosaic internal scratch."""
    cap = 64 * 1024 * 1024  # conservative default (v7x per-TC VMEM)
    try:
        cap = int(pltpu.get_tpu_info().vmem_capacity_bytes)
    except Exception:
        pass
    # 128 MiB parts -> ~96 MiB budget; 64 MiB parts -> 48 MiB budget.
    return min(cap - 16 * 1024 * 1024, (cap * 3) // 4)


def _is_big_vmem():
    return _vmem_budget() > 80 * 1024 * 1024


def _round_up(x, m):
    return ((x + m - 1) // m) * m


def _pick_tile(dim, candidates):
    """Largest candidate that evenly divides `dim`, else the full extent."""
    for c in candidates:
        if dim >= c and dim % c == 0:
            return c
    return dim


def _pad_and_tile(dim, align, candidates):
    """Return (padded_dim, tile) such that tile always divides padded_dim."""
    smallest = candidates[-1]
    if dim <= smallest:
        dp = _round_up(dim, align)
        return dp, dp
    dp = _round_up(dim, smallest)
    for c in candidates:
        if dp % c == 0:
            return dp, c
    return dp, smallest


def _pad2d(a, rows, cols):
    r, c = a.shape
    if r == rows and c == cols:
        return a
    return jnp.pad(a, ((0, rows - r), (0, cols - c)))


# ---------------------------------------------------------------------------
# Tiled projection matmul kernels (K-axis accumulation, bf16 MXU operands)
# ---------------------------------------------------------------------------
def _matmul_kernel(x_ref, w_ref, o_ref, acc_ref):
    @pl.when(pl.program_id(2) == 0)
    def _init():
        acc_ref[...] = jnp.zeros_like(acc_ref)

    acc_ref[...] += jnp.dot(
        x_ref[...], w_ref[...], preferred_element_type=jnp.float32
    )

    @pl.when(pl.program_id(2) == pl.num_programs(2) - 1)
    def _done():
        o_ref[...] = acc_ref[...].astype(o_ref.dtype)


def _matmul_bias_kernel(x_ref, w_ref, b_ref, o_ref, acc_ref):
    @pl.when(pl.program_id(2) == 0)
    def _init():
        acc_ref[...] = jnp.zeros_like(acc_ref)

    acc_ref[...] += jnp.dot(
        x_ref[...], w_ref[...], preferred_element_type=jnp.float32
    )

    @pl.when(pl.program_id(2) == pl.num_programs(2) - 1)
    def _done():
        o_ref[...] = (acc_ref[...] + b_ref[...].astype(jnp.float32)).astype(
            o_ref.dtype
        )


def pallas_matmul(x, w, bias=None):
    """out = x @ w (+ bias). Pads every axis to a tile-friendly size (exact:
    zero padding contributes zero to the accumulation) and feeds the MXU bf16
    operands with an f32 VMEM accumulator."""
    M, K = x.shape
    _, N = w.shape
    out_dtype = x.dtype

    big = _is_big_vmem()
    m_cands = (1024, 512, 256, 128) if big else (512, 256, 128)
    n_cands = (512, 256, 128)
    k_cands = (2048, 1024, 512, 256, 128) if big else (1024, 512, 256, 128)

    Mp, tm = _pad_and_tile(M, 8, m_cands)
    Np, tn = _pad_and_tile(N, 128, n_cands)
    Kp, tk = _pad_and_tile(K, 128, k_cands)

    # bf16 MXU operands (f32 accumulation): halves HBM traffic + block VMEM.
    mxu_dtype = jnp.bfloat16 if x.dtype == jnp.float32 else x.dtype
    xp = _pad2d(x.astype(mxu_dtype), Mp, Kp)
    wp = _pad2d(w.astype(mxu_dtype), Kp, Np)

    grid = (Mp // tm, Np // tn, Kp // tk)

    in_specs = [
        pl.BlockSpec((tm, tk), lambda i, j, k: (i, k)),
        pl.BlockSpec((tk, tn), lambda i, j, k: (k, j)),
    ]
    operands = [xp, wp]
    kernel = _matmul_kernel
    bias_bytes = 0
    if bias is not None:
        bp = jnp.pad(bias.astype(jnp.float32), (0, Np - N)).reshape(1, Np)
        in_specs.append(pl.BlockSpec((1, tn), lambda i, j, k: (0, j)))
        operands.append(bp)
        kernel = _matmul_bias_kernel
        bias_bytes = N * 4

    cost = pl.CostEstimate(
        flops=2 * M * N * K,
        transcendentals=0,
        bytes_accessed=(M * K + K * N) * jnp.dtype(mxu_dtype).itemsize
        + M * N * jnp.dtype(out_dtype).itemsize
        + bias_bytes,
    )

    out = pl.pallas_call(
        kernel,
        out_shape=jax.ShapeDtypeStruct((Mp, Np), out_dtype),
        grid=grid,
        in_specs=in_specs,
        out_specs=pl.BlockSpec((tm, tn), lambda i, j, k: (i, j)),
        scratch_shapes=[pltpu.VMEM((tm, tn), jnp.float32)],
        compiler_params=pltpu.CompilerParams(
            dimension_semantics=("parallel", "parallel", "arbitrary"),
            vmem_limit_bytes=_vmem_budget(),
        ),
        cost_estimate=cost,
    )(*operands)

    if Mp != M or Np != N:
        out = out[:M, :N]
    return out


# ---------------------------------------------------------------------------
# Flash-style attention kernel (online softmax, one head per grid step)
# ---------------------------------------------------------------------------
def _flash_attn_kernel(q_ref, k_ref, v_ref, o_ref, m_sc, l_sc, acc_sc):
    kv_idx = pl.program_id(2)

    @pl.when(kv_idx == 0)
    def _init():
        m_sc[...] = jnp.full(m_sc.shape, -jnp.inf, m_sc.dtype)
        l_sc[...] = jnp.zeros(l_sc.shape, l_sc.dtype)
        acc_sc[...] = jnp.zeros(acc_sc.shape, acc_sc.dtype)

    q = q_ref[0]  # (tq, D)  bf16, scale already folded into the QKV weight
    k = k_ref[0]  # (tk, D)  bf16
    v = v_ref[0]  # (tk, D)  bf16

    # Contract on the feature axis directly (no .T / XLU transpose).
    dnums = (((1,), (1,)), ((), ()))
    s = lax.dot_general(q, k, dnums, preferred_element_type=jnp.float32)  # (tq, tk)

    m_prev = m_sc[...]                                      # (tq, 1)
    m_new = jnp.maximum(m_prev, jnp.max(s, axis=-1, keepdims=True))
    alpha = jnp.exp(m_prev - m_new)
    p = jnp.exp(s - m_new)                                  # (tq, tk) f32

    l_sc[...] = alpha * l_sc[...] + jnp.sum(p, axis=-1, keepdims=True)
    acc_sc[...] = alpha * acc_sc[...] + jnp.dot(
        p.astype(v.dtype), v, preferred_element_type=jnp.float32
    )
    m_sc[...] = m_new

    @pl.when(kv_idx == pl.num_programs(2) - 1)
    def _finalize():
        inv_l = pl.reciprocal(l_sc[...], approx=True)       # EUP slot
        # Single lane-dense store of the whole (tq, D) output tile.
        o_ref[0] = (acc_sc[...] * inv_l).astype(o_ref.dtype)


def pallas_flash_attention(q, k, v):
    """q, k, v: (B*heads, N, dim_head). Scale must already be folded into q."""
    BH, N, D = q.shape
    out_dtype = q.dtype

    big = _is_big_vmem()
    # tq kept at 128 to bound the (tq, tk) score/prob intermediate footprint;
    # tk grows with the VMEM budget to cut the number of K/V re-streams.
    tq = _pick_tile(N, (128,))
    tk = _pick_tile(N, (512, 256, 128) if big else (256, 128))
    nq, nk = N // tq, N // tk
    # TODO(synk): for N not divisible by the kv tile this falls back to a single
    # full-extent kv block; add explicit kv masking to allow padded/ragged N.

    # bf16 MXU operands (f32 accumulation inside the kernel).
    if q.dtype == jnp.float32:
        q, k, v = (t.astype(jnp.bfloat16) for t in (q, k, v))
    itemsize = jnp.dtype(q.dtype).itemsize

    q_spec = pl.BlockSpec((1, tq, D), lambda b, qi, ki: (b, qi, 0))
    k_spec = pl.BlockSpec((1, tk, D), lambda b, qi, ki: (b, ki, 0))
    v_spec = pl.BlockSpec((1, tk, D), lambda b, qi, ki: (b, ki, 0))
    o_spec = pl.BlockSpec((1, tq, D), lambda b, qi, ki: (b, qi, 0))

    cost = pl.CostEstimate(
        flops=4 * BH * N * N * D,
        transcendentals=BH * N * N,
        # q is resident across the kv axis; K/V are re-streamed per q block.
        bytes_accessed=BH * N * D * (itemsize * (1 + 2 * nq)
                                     + jnp.dtype(out_dtype).itemsize),
    )

    return pl.pallas_call(
        _flash_attn_kernel,
        out_shape=jax.ShapeDtypeStruct((BH, N, D), out_dtype),
        grid=(BH, nq, nk),
        in_specs=[q_spec, k_spec, v_spec],
        out_specs=o_spec,
        scratch_shapes=[
            pltpu.VMEM((tq, 1), jnp.float32),   # running max
            pltpu.VMEM((tq, 1), jnp.float32),   # running sum
            pltpu.VMEM((tq, D), jnp.float32),   # output accumulator (lane-dense)
        ],
        compiler_params=pltpu.CompilerParams(
            dimension_semantics=("parallel", "parallel", "arbitrary"),
            vmem_limit_bytes=_vmem_budget(),
        ),
        cost_estimate=cost,
    )(q, k, v)


# ---------------------------------------------------------------------------
# Attention module (functional, parameters passed explicitly)
# ---------------------------------------------------------------------------
def init_attention_params(key, dim, heads, dim_head):
    inner_dim = dim_head * heads
    k1, k2, k3 = jax.random.split(key, 3)
    # to_qkv.weight in PyTorch is (3*inner_dim, dim); we store its transpose.
    w_qkv = jax.random.normal(k1, (dim, 3 * inner_dim), jnp.float32) * 0.05
    w_out = jax.random.normal(k2, (inner_dim, dim), jnp.float32) * 0.05
    b_out = jax.random.normal(k3, (dim,), jnp.float32) * 0.01
    return {"w_qkv": w_qkv, "w_out": w_out, "b_out": b_out}


def attention_forward(params, x, heads, dim_head):
    # x: (B, N, DIM)
    B, N, DIM = x.shape
    inner_dim = heads * dim_head
    scale = dim_head ** (-0.5)
    project_out = not (heads == 1 and dim_head == DIM)

    # Fold the softmax scale into the q-columns of the QKV weight: one-time
    # O(dim*inner) op instead of a q*scale multiply on every kv step.
    w_qkv = params["w_qkv"]
    w_qkv = jnp.concatenate(
        [w_qkv[:, :inner_dim] * scale, w_qkv[:, inner_dim:]], axis=-1
    )

    # --- QKV projection (tiled Pallas matmul, bias=False like the module) ---
    qkv = pallas_matmul(x.reshape(B * N, DIM), w_qkv)        # (B*N, 3*inner)

    # Split heads onto a leading axis: one cheap O(B*N*inner) XLA transpose so
    # the flash kernel sees clean (tq, D)/(tk, D) tiles (no lane-offset slicing).
    qkv = qkv.reshape(B, N, 3, heads, dim_head)
    qkv = qkv.transpose(2, 0, 3, 1, 4).reshape(3, B * heads, N, dim_head)
    q, k, v = qkv[0], qkv[1], qkv[2]                          # each (B*H, N, D)

    # --- flash-style scaled dot-product attention (Pallas kernel) ---
    out = pallas_flash_attention(q, k, v)                     # (B*H, N, D)
    out = (
        out.reshape(B, heads, N, dim_head)
        .transpose(0, 2, 1, 3)
        .reshape(B, N, inner_dim)
    )

    # --- output projection + dropout(p=0.0) == identity ---
    if project_out:
        out = pallas_matmul(
            out.reshape(B * N, inner_dim), params["w_out"], params["b_out"]
        ).reshape(B, N, DIM)
    return out


# pure-JAX reference for sanity checking
def attention_reference(params, x, heads, dim_head):
    B, N, DIM = x.shape
    inner_dim = heads * dim_head
    scale = dim_head ** (-0.5)
    qkv = x @ params["w_qkv"]
    q, k, v = jnp.split(qkv, 3, axis=-1)
    rh = lambda t: t.reshape(B, N, heads, dim_head).transpose(0, 2, 1, 3)
    q, k, v = map(rh, (q, k, v))
    dots = jnp.einsum("bhid,bhjd->bhij", q, k) * scale
    attn = jax.nn.softmax(dots, axis=-1)
    out = jnp.einsum("bhij,bhjd->bhid", attn, v)
    out = out.transpose(0, 2, 1, 3).reshape(B, N, inner_dim)
    return out @ params["w_out"] + params["b_out"]


if __name__ == "__main__":
    B, N, DIM = 2, 8, 32
    HEADS, DIM_HEAD = 4, 16

    key = jax.random.PRNGKey(0)
    kp, kx = jax.random.split(key)
    params = init_attention_params(kp, DIM, HEADS, DIM_HEAD)
    x = jax.random.normal(kx, (B, N, DIM), jnp.float32)

    out = attention_forward(params, x, HEADS, DIM_HEAD)
    out = jax.block_until_ready(out)

    ref = attention_reference(params, x, HEADS, DIM_HEAD)
    assert out.shape == (B, N, DIM), out.shape
    err = float(jnp.max(jnp.abs(out - ref)))
    # bf16 MXU operands + approx reciprocal in the softmax denominator cost a
    # little precision relative to the pure-f32 reference.
    assert err < 2e-2, err
    print("KERNEL_OK")
</pallas_src>

<mosaic_0001>
module attributes {stable_mosaic.version = 11 : i64} {
  func.func @_matmul_kernel(%arg0: i32, %arg1: i32, %arg2: i32, %arg3: memref<16x128xbf16, #tpu.memory_space<vmem>>, %arg4: memref<128x256xbf16, #tpu.memory_space<vmem>>, %arg5: memref<16x256xf32, #tpu.memory_space<vmem>>, %arg6: memref<16x256xf32, #tpu.memory_space<vmem>>) attributes {dimension_semantics = [#tpu.dimension_semantics<parallel>, #tpu.dimension_semantics<parallel>, #tpu.dimension_semantics<arbitrary>], iteration_bounds = array<i64: 1, 1, 1>, scalar_prefetch = 0 : i64, scratch_operands = 1 : i64, tpu.core_type = #tpu.core_type<tc>, window_params = [{transform_indices = @transform_0, window_bounds = array<i64: 16, 128>}, {transform_indices = @transform_1, window_bounds = array<i64: 128, 256>}, {transform_indices = @transform_2, window_bounds = array<i64: 16, 256>}]} {
    %c0_i32 = arith.constant 0 : i32
    %0 = arith.cmpi eq, %arg2, %c0_i32 : i32
    %1 = arith.extui %0 : i1 to i32
    %c0_i32_0 = arith.constant 0 : i32
    %2 = arith.cmpi ne, %1, %c0_i32_0 : i32
    scf.if %2 {
      %cst_10 = arith.constant 0.000000e+00 : f32
      %12 = vector.broadcast %cst_10 : f32 to vector<16x256xf32>
      %c0_11 = arith.constant 0 : index
      %c0_12 = arith.constant 0 : index
      %13 = vector.load %arg6[%c0_11, %c0_12] : memref<16x256xf32, #tpu.memory_space<vmem>>, vector<16x256xf32>
      tpu.vector_store %arg6[%c0_11, %c0_12], %12 {strides = array<i32>} : memref<16x256xf32, #tpu.memory_space<vmem>>, vector<16x256xf32>,
    } else {
    }
    %c0 = arith.constant 0 : index
    %c0_1 = arith.constant 0 : index
    %3 = vector.load %arg6[%c0, %c0_1] : memref<16x256xf32, #tpu.memory_space<vmem>>, vector<16x256xf32>
    %c0_2 = arith.constant 0 : index
    %c0_3 = arith.constant 0 : index
    %4 = vector.load %arg3[%c0_2, %c0_3] : memref<16x128xbf16, #tpu.memory_space<vmem>>, vector<16x128xbf16>
    %c0_4 = arith.constant 0 : index
    %c0_5 = arith.constant 0 : index
    %5 = vector.load %arg4[%c0_4, %c0_5] : memref<128x256xbf16, #tpu.memory_space<vmem>>, vector<128x256xbf16>
    %cst = arith.constant dense<0.000000e+00> : vector<16x256xf32>
    %6 = tpu.matmul %4, %5, %cst {dimension_numbers = #tpu.dot_dimension_numbers<[1], [0], [0], [1], [0, 0, 1, 1], [], []>} : vector<16x128xbf16>, vector<128x256xbf16>, vector<16x256xf32> -> vector<16x256xf32>
    %7 = arith.addf %3, %6 : vector<16x256xf32>
    %c0_6 = arith.constant 0 : index
    %c0_7 = arith.constant 0 : index
    %8 = vector.load %arg6[%c0_6, %c0_7] : memref<16x256xf32, #tpu.memory_space<vmem>>, vector<16x256xf32>
    tpu.vector_store %arg6[%c0_6, %c0_7], %7 {strides = array<i32>} : memref<16x256xf32, #tpu.memory_space<vmem>>, vector<16x256xf32>,
    %c0_i32_8 = arith.constant 0 : i32
    %9 = arith.cmpi eq, %arg2, %c0_i32_8 : i32
    %10 = arith.extui %9 : i1 to i32
    %c0_i32_9 = arith.constant 0 : i32
    %11 = arith.cmpi ne, %10, %c0_i32_9 : i32
    scf.if %11 {
      %c0_10 = arith.constant 0 : index
      %c0_11 = arith.constant 0 : index
      %12 = vector.load %arg6[%c0_10, %c0_11] : memref<16x256xf32, #tpu.memory_space<vmem>>, vector<16x256xf32>
      %c0_12 = arith.constant 0 : index
      %c0_13 = arith.constant 0 : index
      %13 = vector.load %arg5[%c0_12, %c0_13] : memref<16x256xf32, #tpu.memory_space<vmem>>, vector<16x256xf32>
      tpu.vector_store %arg5[%c0_12, %c0_13], %12 {strides = array<i32>} : memref<16x256xf32, #tpu.memory_space<vmem>>, vector<16x256xf32>,
    } else {
    }
    return
  }
  func.func @transform_0(%arg0: i32, %arg1: i32, %arg2: i32) -> (i32, i32) {
    %c0_i32 = arith.constant 0 : i32
    return %arg0, %arg2 : i32, i32
  }
  func.func @transform_1(%arg0: i32, %arg1: i32, %arg2: i32) -> (i32, i32) {
    %c0_i32 = arith.constant 0 : i32
    return %arg2, %arg1 : i32, i32
  }
  func.func @transform_2(%arg0: i32, %arg1: i32, %arg2: i32) -> (i32, i32) {
    %c0_i32 = arith.constant 0 : i32
    return %arg0, %arg1 : i32, i32
  }
}

</mosaic_0001>

<bundles_post_ra>
// kernel: tpu_custom_call.1
= control target key start
LH: loop header
LB: loop body
LE: loop exit
PB: predicated region body
PF: predicated region fallthrough
CT: control target
= control target key end

     0   :  { %7 = vsyncpa [#allocation4], 0  ;;  %s389_s0 = inlined_call_operand.hbm [shape: bf16[16,128], index: 0, kind: input, shape index: {}]   ;;  %s390_s1 = inlined_call_operand.hbm [shape: bf16[128,256], index: 1, kind: input, shape index: {}]   ;;  %s391_s2 = inlined_call_operand.hbm [shape: f32[16,256], index: 2, kind: output, shape index: {}]  }
   0x1   :  { %8 = vsyncpa [#allocation7], 0 }
   0x2   :  { %9 = vsyncpa [#allocation5], 0  ;;  %s355_s9 = smov [#allocation3]  }
   0x3   :  { %s15_s10 = sshll.u32 %s355_s9, 4  ;;  %s16_s10 = int_to_ptr.vmem [resolvable:$true] %s15_s10 }
   0x4   :  { %s297_s11 = scalar_lea.vmem %s16_s10, 128  ;;  %p302_p1 = scmp.lt.s32.totalorder %s16_s10, %s16_s10 }
   0x5   :  { %p298_p0 = scmp.ne.s32.totalorder %s16_s10, %s297_s11  ;;  %p303_p2 = scmp.lt.s32.totalorder %s297_s11, %s297_s11 }
   0x7   :  { %p304_p3 = por %p303_p2, %p302_p1 }
   0x9   :  { %p305_p4 = pnand %p304_p3, %p298_p0 }
   0xb   :  { %308 = shalt.err (!%p305_p4)
}
   0xc   :  { %s356_s12 = smov 64   ;;  %s357_s13 = smov 4  }
   0xd   :  { %21 = dma.hbm_to_vmem [thread:$0]  %s389_s0, 128, %s16_s10, [#allocation4], %s356_s12, %s356_s12, %s357_s13  }
   0xe   :  { %s358_s16 = smov [#allocation6]  }
   0xf   :  { %s27_s17 = sshll.u32 %s358_s16, 4  ;;  %s28_s17 = int_to_ptr.vmem [resolvable:$true] %s27_s17 }
  0x10   :  { %s317_s18 = scalar_lea.vmem %s28_s17, 2048  ;;  %p322_p6 = scmp.lt.s32.totalorder %s28_s17, %s28_s17 }
  0x11   :  { %p318_p5 = scmp.ne.s32.totalorder %s28_s17, %s317_s18  ;;  %p323_p7 = scmp.lt.s32.totalorder %s317_s18, %s317_s18 }
  0x13   :  { %p324_p8 = por %p323_p7, %p322_p6 }
  0x15   :  { %p325_p9 = pnand %p324_p8, %p318_p5 }
  0x17   :  { %328 = shalt.err (!%p325_p9)
}
  0x18   :  { %s359_s19 = smov 128   ;;  %s360_s20 = smov 8  }
  0x19   :  { %33 = dma.hbm_to_vmem [thread:$0]  %s390_s1, 2048, %s28_s17, [#allocation7], %s359_s19, %s359_s19, %s360_s20  }
  0x1a   :  { %349 = dma.done.wait [#allocation4], 128  }
  0x1b   :  { %350 = vsyncadd [#allocation4], 4294967168 }
  0x1c   :  { %351 = dma.done.wait [#allocation7], 2048  }
  0x1d   :  { %352 = vsyncadd [#allocation7], 4294965248  ;;  %v361_v0 = vmov 0   ;;  %v264_v1 = vld [vmem:[#allocation6 + $0x74] ss:$8 sps:$4 sm:$0xff]   ;;  %s362_s0 = smov [#allocation8]  }
  0x1e   :  { %189 = vmatprep.mubr.bf16.mxu0 %v361_v0  ;;  %v266_v2 = vld [vmem:[#allocation6 + $0x70] ss:$8 sps:$4 sm:$0xff]   ;;  %157 = vmatprep.subr.bf16.mxu0 %v264_v1  ;;  %v267_v3 = vld [vmem:[#allocation6 + $0x64] ss:$8 sps:$4 sm:$0xff]   ;;  %v269_v4 = vld [vmem:[#allocation6 + $0x60] ss:$8 sps:$4 sm:$0xff]  }
  0x1f   :  { %158 = vmatpush1.bf16.msra.mxu0 %v266_v2  ;;  %v270_v5 = vld [vmem:[#allocation6 + $0x54] ss:$8 sps:$4 sm:$0xff]   ;;  %v272_v6 = vld [vmem:[#allocation6 + $0x50] ss:$8 sps:$4 sm:$0xff]   ;;  %v273_v7 = vld [vmem:[#allocation6 + $0x44] ss:$8 sps:$4 sm:$0xff]  }
  0x20   :  { %159 = vmatprep.subr.bf16.mxu0 %v267_v3  ;;  %v275_v8 = vld [vmem:[#allocation6 + $0x40] ss:$8 sps:$4 sm:$0xff]   ;;  %v276_v9 = vld [vmem:[#allocation6 + $0x34] ss:$8 sps:$4 sm:$0xff]   ;;  %v278_v10 = vld [vmem:[#allocation6 + $0x30] ss:$8 sps:$4 sm:$0xff]  }
  0x21   :  { %v279_v11 = vld [vmem:[#allocation6 + $0x24] ss:$8 sps:$4 sm:$0xff]   ;;  %v281_v12 = vld [vmem:[#allocation6 + $0x20] ss:$8 sps:$4 sm:$0xff]   ;;  %v282_v13 = vld [vmem:[#allocation6 + $0x14] ss:$8 sps:$4 sm:$0xff]  }
  0x22   :  { %v284_v14 = vld [vmem:[#allocation6 + $0x10] ss:$8 sps:$4 sm:$0xff]   ;;  %v285_v15 = vld [vmem:[#allocation6 + $0x4] ss:$8 sps:$4 sm:$0xff]   ;;  %v287_v16 = vld [vmem:[#allocation6] ss:$8 sps:$4 sm:$0xff]  }
  0x23   :  { %160 = vmatpush1.bf16.msra.mxu0 %v269_v4  ;;  %v288_v17 = vld [vmem:[#allocation3] sm:$0xff]   ;;  %s224_s1 = sshll.u32 %s362_s0, 4  ;;  %s225_s1 = int_to_ptr.vmem [resolvable:$true] %s224_s1 }
  0x24   :  { %161 = vmatprep.subr.bf16.mxu0 %v270_v5  ;;  %s329_s23 = scalar_lea.vmem %s225_s1, 512  ;;  %p334_p11 = scmp.lt.s32.totalorder %s225_s1, %s225_s1 }
  0x25   :  { %p330_p10 = scmp.ne.s32.totalorder %s225_s1, %s329_s23  ;;  %p335_p12 = scmp.lt.s32.totalorder %s329_s23, %s329_s23 }
  0x27   :  { %162 = vmatpush1.bf16.msra.mxu0 %v272_v6  ;;  %p336_p13 = por %p335_p12, %p334_p11 }
  0x28   :  { %163 = vmatprep.subr.bf16.mxu0 %v273_v7 }
  0x29   :  { %p337_p0 = pnand %p336_p13, %p330_p10 }
  0x2b   :  { %164 = vmatpush1.bf16.msra.mxu0 %v275_v8 }
  0x2c   :  { %165 = vmatprep.subr.bf16.mxu0 %v276_v9 }
  0x2f   :  { %166 = vmatpush1.bf16.msra.mxu0 %v278_v10 }
  0x30   :  { %167 = vmatprep.subr.bf16.mxu0 %v279_v11 }
  0x33   :  { %168 = vmatpush1.bf16.msra.mxu0 %v281_v12 }
  0x34   :  { %169 = vmatprep.subr.bf16.mxu0 %v282_v13 }
  0x37   :  { %170 = vmatpush1.bf16.msra.mxu0 %v284_v14 }
  0x38   :  { %171 = vmatprep.subr.bf16.mxu0 %v285_v15 }
  0x3b   :  { %172 = vmatpush1.bf16.msra.mxu0 %v287_v16 }
  0x3e   :  { %190 = vmatmul.mubr.bf16.vlgmr.msra.gmra.mxu0 %v288_v17 }
  0xfe   :  { %v191_v18 = vpop.f32.mrf.mxu0 }
  0xff   :  { %215 = vst [vmem:[#allocation8] sm:$0xff] %v191_v18 }
 0x100   :  { %v193_v19 = vpop.f32.mrf.mxu0 }
 0x101   :  { %216 = vst [vmem:[#allocation8 + $0x8] sm:$0xff] %v193_v19 }
 0x102   :  { %v195_v20 = vpop.f32.mrf.mxu0 }
 0x103   :  { %217 = vst [vmem:[#allocation8 + $0x10] sm:$0xff] %v195_v20 }
 0x104   :  { %v197_v21 = vpop.f32.mrf.mxu0 }
 0x105   :  { %218 = vst [vmem:[#allocation8 + $0x18] sm:$0xff] %v197_v21 }
 0x106   :  { %340 = shalt.err (!%p337_p0)
}
 0x107   :  { %s363_s24 = smov 256   ;;  %s364_s25 = smov 16  }
 0x108   :  { %230 = dma.vmem_to_hbm [thread:$0]  %s225_s1, 512, %s391_s2, [#allocation5], %s363_s24, %s363_s24, %s364_s25  }
 0x109   :  { %353 = dma.done.wait [#allocation5], 512  }
 0x10a   :  { %354 = vsyncadd [#allocation5], 4294966784 }
 0x10b   :  { %234 = vsyncpa [#allocation4], 1 }
 0x10c   :  { %235 = vsyncpa [#allocation7], 1 }
 0x10d   :  { %236 = vsyncpa [#allocation5], 1 }

</bundles_post_ra>
